<compile_context>
chip_gen: v7x
topology: tpu7x:2x2x1
jax: 0.10.0
libtpu: 0.0.40
codegen_flags: <defaults>
</compile_context>

<pallas_src>
import functools

import jax
import jax.numpy as jnp
from jax import lax
from jax.experimental import pallas as pl
from jax.experimental.pallas import tpu as pltpu

LAMBDA_ISLAND = 10.0


def _round_up(n, m):
    return ((n + m - 1) // m) * m


def _pick_block(batch, num_classes, block_b):
    """Pick the batch tile size (multiple of 8); avoid padding x when possible."""
    # Bound the (tb, C) one-hot tile to ~2 MiB f32 so large C doesn't blow VMEM.
    onehot_cap = max(8, ((2 * 1024 * 1024 // (4 * max(num_classes, 1))) // 8) * 8)
    cap = max(8, min(_round_up(block_b, 8), _round_up(batch, 8), onehot_cap))
    if batch % 8 == 0:
        # Largest multiple of 8 that divides B (<= cap): no HBM pad of x needed.
        for cand in range(cap, 0, -8):
            if batch % cand == 0:
                return cand, batch
    # TODO(synk): a ragged-tail second call would avoid padding x entirely when
    # B is not a multiple of 8; padding is the simple fallback here.
    return cap, _round_up(batch, cap)


def _island_loss_kernel(labels_ref,    # VMEM (tb, 1) int32
                        x_ref,         # VMEM (tb, D)
                        centers_ref,   # VMEM (C, D)  (resident, constant block)
                        out_ref,       # VMEM (1, 8, 128) f32: this block's partial
                        *, batch_size, num_classes, block_b, lambda_island):
    i = pl.program_id(0)

    c = centers_ref[...].astype(jnp.float32)                        # (C, D)

    # ---- center-loss partial for this batch tile (lane-dense, MXU gather) ----
    labels = labels_ref[...]                                        # (tb, 1) int32
    one_hot = (lax.broadcasted_iota(jnp.int32, (block_b, num_classes), 1)
               == labels).astype(jnp.float32)                       # (tb, C)
    c_sel = jnp.dot(one_hot, c, preferred_element_type=jnp.float32)  # (tb, D)
    x = x_ref[...].astype(jnp.float32)                              # (tb, D)
    diff = x - c_sel
    d = jnp.sum(diff * diff, axis=1, keepdims=True)                 # (tb, 1)
    d = jnp.clip(d, 1e-12, 1e12)                                    # torch clamp parity
    # Mask rows that only exist because B was padded up to a tile multiple.
    row = i * block_b + lax.broadcasted_iota(jnp.int32, (block_b, 1), 0)
    d = jnp.where(row < batch_size, d, 0.0)
    partial = jnp.sum(d) / jnp.float32(batch_size)

    # Lane-dense output tile; the wrapper reads element [0, 0].
    out_ref[...] = partial * jnp.ones(out_ref.shape, jnp.float32)

    # ---- island term depends only on centers: do it once, at step 0, where it
    #      overlaps with the prefetch of the remaining x tiles -----------------
    @pl.when(i == 0)
    def _():
        # TODO(synk): for very large C (C*C*4 or C*D*4 in the tens of MiB) this
        # should be tiled / streamed for v7x's 64 MiB VMEM.
        c_sq = jnp.sum(c * c, axis=1, keepdims=True)                # (C, 1)
        # centers @ centers.T without materializing a transpose.
        cc = lax.dot_general(c, c, (((1,), (1,)), ((), ())),
                             preferred_element_type=jnp.float32)    # (C, C)
        norm = jnp.sqrt(c_sq)                                       # (C, 1)
        denom = norm * norm.T + 1e-12                               # torch eps placement
        cos = cc / denom
        # Diagonal removal and the "+1 over all C^2 entries" handled analytically.
        diag = jnp.sum(c_sq / (c_sq + 1e-12))
        island = jnp.sum(cos) - diag + jnp.float32(num_classes * num_classes)
        # (C-1)*1e-12 accounts for the B*(C-1) masked zeros torch clamps to 1e-12
        # before dividing by B.
        extra = (jnp.float32((num_classes - 1) * 1e-12)
                 + jnp.float32(lambda_island) * island)
        out_ref[...] = out_ref[...] + extra


def island_loss(x, centers, labels, *, lambda_island=LAMBDA_ISLAND, block_b=1024):
    """x: (B, D) f32/bf16, centers: (C, D) f32/bf16, labels: (B,) int -> scalar f32."""
    B, D = x.shape
    C = centers.shape[0]

    tb, b_pad = _pick_block(B, C, block_b)
    nb = b_pad // tb

    labels2d = labels.astype(jnp.int32).reshape(B, 1)
    if b_pad != B:
        x = jnp.pad(x, ((0, b_pad - B), (0, 0)))
        labels2d = jnp.pad(labels2d, ((0, b_pad - B), (0, 0)))

    kernel = functools.partial(
        _island_loss_kernel,
        batch_size=B, num_classes=C, block_b=tb,
        lambda_island=float(lambda_island))

    itemsize = jnp.dtype(x.dtype).itemsize
    need = (2 * tb * D * itemsize      # x tiles (double-buffered)
            + 2 * tb * 4               # label tiles
            + 2 * C * D * 4            # resident centers (pipeline double-buffer)
            + tb * C * 4               # one-hot
            + tb * D * 4               # gathered-centers / diff temporaries
            + 2 * C * C * 4            # cc / cos for the island term
            + (4 << 20))               # headroom
    vmem_limit = int(min(64 * 1024 * 1024, max(32 * 1024 * 1024, need)))

    out = pl.pallas_call(
        kernel,
        out_shape=jax.ShapeDtypeStruct((nb, 8, 128), jnp.float32),
        grid=(nb,),
        in_specs=[
            pl.BlockSpec((tb, 1), lambda i: (i, 0)),     # labels tile
            pl.BlockSpec((tb, D), lambda i: (i, 0)),     # x tile (streamed)
            pl.BlockSpec((C, D), lambda i: (0, 0)),      # centers (resident)
        ],
        out_specs=pl.BlockSpec((1, 8, 128), lambda i: (i, 0, 0)),
        compiler_params=pltpu.CompilerParams(
            dimension_semantics=("parallel",),           # v7x: shard over both TCs
            vmem_limit_bytes=vmem_limit),
    )(labels2d, x, centers)

    return jnp.sum(out[:, 0, 0])


def island_loss_ref(x, centers, labels, lambda_island=LAMBDA_ISLAND):
    """Pure-JAX reference mirroring the PyTorch forward exactly."""
    B = x.shape[0]
    C = centers.shape[0]
    distmat = (
        jnp.sum(x**2, axis=1, keepdims=True)
        + jnp.sum(centers**2, axis=1, keepdims=True).T
        - 2.0 * x @ centers.T
    )
    mask = (labels[:, None] == jnp.arange(C)[None, :]).astype(jnp.float32)
    dist = jnp.clip(distmat * mask, 1e-12, 1e12)
    center_loss = dist.sum() / B
    norm_c = jnp.linalg.norm(centers, axis=1, keepdims=True)
    cos = (centers @ centers.T) / (norm_c @ norm_c.T + 1e-12)
    cos = cos * (1.0 - jnp.eye(C, dtype=jnp.float32))
    island = (cos + 1.0).sum()
    return center_loss + lambda_island * island


if __name__ == "__main__":
    num_classes = 8
    feat_dim = 128
    batch_size = 16

    key = jax.random.PRNGKey(0)
    k_x, k_c, k_l = jax.random.split(key, 3)

    x = jax.random.normal(k_x, (batch_size, feat_dim), dtype=jnp.float32)
    # Deterministic "randn" init of the centers parameter (nn.Parameter(torch.randn(...))).
    centers = jax.random.normal(k_c, (num_classes, feat_dim), dtype=jnp.float32)
    labels = jax.random.randint(k_l, (batch_size,), 0, num_classes, dtype=jnp.int32)

    ref = jax.block_until_ready(island_loss_ref(x, centers, labels))

    # Default tiling (single grid step at this tiny size).
    loss = jax.block_until_ready(island_loss(x, centers, labels))
    # block_b=8 -> 2-step grid, exercising the per-block partial / island@step0 path.
    loss_multi = jax.block_until_ready(island_loss(x, centers, labels, block_b=8))

    assert jnp.allclose(loss, ref, rtol=1e-4, atol=1e-2), (loss, ref)
    assert jnp.allclose(loss_multi, ref, rtol=1e-4, atol=1e-2), (loss_multi, ref)
    print("KERNEL_OK")
</pallas_src>

<mosaic_0001>
module attributes {stable_mosaic.version = 11 : i64} {
  func.func @_island_loss_kernel(%arg0: i32, %arg1: memref<16x1xi32, #tpu.memory_space<vmem>>, %arg2: memref<16x128xf32, #tpu.memory_space<vmem>>, %arg3: memref<8x128xf32, #tpu.memory_space<vmem>>, %arg4: memref<1x8x128xf32, #tpu.memory_space<vmem>>) attributes {dimension_semantics = [#tpu.dimension_semantics<parallel>], iteration_bounds = array<i64: 1>, scalar_prefetch = 0 : i64, scratch_operands = 0 : i64, tpu.core_type = #tpu.core_type<tc>, window_params = [{transform_indices = @transform_0, window_bounds = array<i64: 16, 1>}, {transform_indices = @transform_1, window_bounds = array<i64: 16, 128>}, {pipeline_mode = #tpu.pipeline_mode<synchronous>, transform_indices = @transform_2, window_bounds = array<i64: 8, 128>}, {transform_indices = @transform_3, window_bounds = array<i64: 1, 8, 128>}]} {
    %c0 = arith.constant 0 : index
    %c0_0 = arith.constant 0 : index
    %0 = vector.load %arg3[%c0, %c0_0] : memref<8x128xf32, #tpu.memory_space<vmem>>, vector<8x128xf32>
    %c0_1 = arith.constant 0 : index
    %c0_2 = arith.constant 0 : index
    %1 = vector.load %arg1[%c0_1, %c0_2] : memref<16x1xi32, #tpu.memory_space<vmem>>, vector<16x1xi32>
    %2 = tpu.iota {dimensions = array<i32: 1>} : vector<16x8xi32>
    %3 = vector.broadcast %1 : vector<16x1xi32> to vector<16x8xi32>
    %4 = arith.cmpi eq, %2, %3 : vector<16x8xi32>
    %5 = arith.extui %4 : vector<16x8xi1> to vector<16x8xi32>
    %6 = arith.sitofp %5 : vector<16x8xi32> to vector<16x8xf32>
    %cst = arith.constant dense<0.000000e+00> : vector<16x128xf32>
    %7 = tpu.matmul %6, %0, %cst {dimension_numbers = #tpu.dot_dimension_numbers<[1], [0], [0], [1], [0, 0, 1, 1], [], []>} : vector<16x8xf32>, vector<8x128xf32>, vector<16x128xf32> -> vector<16x128xf32>
    %c0_3 = arith.constant 0 : index
    %c0_4 = arith.constant 0 : index
    %8 = vector.load %arg2[%c0_3, %c0_4] : memref<16x128xf32, #tpu.memory_space<vmem>>, vector<16x128xf32>
    %9 = arith.subf %8, %7 : vector<16x128xf32>
    %10 = arith.mulf %9, %9 : vector<16x128xf32>
    %cst_5 = arith.constant dense<0.000000e+00> : vector<16xf32>
    %11 = vector.multi_reduction <add>, %10, %cst_5 [1] : vector<16x128xf32> to vector<16xf32>
    %12 = vector.shape_cast %11 : vector<16xf32> to vector<16x1xf32>
    %cst_6 = arith.constant 9.99999996E-13 : f32
    %cst_7 = arith.constant 9.99999995E+11 : f32
    %13 = vector.broadcast %cst_6 : f32 to vector<16x1xf32>
    %14 = arith.maximumf %13, %12 : vector<16x1xf32>
    %15 = vector.broadcast %cst_7 : f32 to vector<16x1xf32>
    %16 = arith.minimumf %15, %14 : vector<16x1xf32>
    %c16_i32 = arith.constant 16 : i32
    %17 = arith.muli %arg0, %c16_i32 : i32
    %18 = tpu.iota {dimensions = array<i32: 0>} : vector<16x1xi32>
    %19 = vector.broadcast %17 : i32 to vector<16x1xi32>
    %20 = arith.addi %19, %18 : vector<16x1xi32>
    %c16_i32_8 = arith.constant 16 : i32
    %21 = vector.broadcast %c16_i32_8 : i32 to vector<16x1xi32>
    %22 = arith.cmpi slt, %20, %21 : vector<16x1xi32>
    %cst_9 = arith.constant 0.000000e+00 : f32
    %23 = vector.broadcast %cst_9 : f32 to vector<16x1xf32>
    %24 = arith.select %22, %16, %23 : vector<16x1xi1>, vector<16x1xf32>
    %25 = vector.shape_cast %24 : vector<16x1xf32> to vector<1x16x1xf32>
    %cst_10 = arith.constant dense<0.000000e+00> : vector<1xf32>
    %26 = vector.multi_reduction <add>, %25, %cst_10 [1, 2] : vector<1x16x1xf32> to vector<1xf32>
    %27 = vector.shape_cast %26 : vector<1xf32> to vector<1x1x1xf32>
    %28 = vector.extract %27[0, 0, 0] : f32 from vector<1x1x1xf32>
    %cst_11 = arith.constant 1.600000e+01 : f32
    %29 = arith.divf %28, %cst_11 : f32
    %cst_12 = arith.constant 1.000000e+00 : f32
    %30 = vector.broadcast %cst_12 : f32 to vector<1x8x128xf32>
    %31 = vector.broadcast %29 : f32 to vector<1x8x128xf32>
    %32 = arith.mulf %31, %30 : vector<1x8x128xf32>
    %c0_13 = arith.constant 0 : index
    %c0_14 = arith.constant 0 : index
    %c0_15 = arith.constant 0 : index
    %33 = vector.load %arg4[%c0_13, %c0_14, %c0_15] : memref<1x8x128xf32, #tpu.memory_space<vmem>>, vector<1x8x128xf32>
    tpu.vector_store %arg4[%c0_13, %c0_14, %c0_15], %32 {strides = array<i32>} : memref<1x8x128xf32, #tpu.memory_space<vmem>>, vector<1x8x128xf32>,
    %c0_i32 = arith.constant 0 : i32
    %34 = arith.cmpi eq, %arg0, %c0_i32 : i32
    %35 = arith.extui %34 : i1 to i32
    %c0_i32_16 = arith.constant 0 : i32
    %36 = arith.cmpi ne, %35, %c0_i32_16 : i32
    scf.if %36 {
      %37 = arith.mulf %0, %0 : vector<8x128xf32>
      %cst_17 = arith.constant dense<0.000000e+00> : vector<8xf32>
      %38 = vector.multi_reduction <add>, %37, %cst_17 [1] : vector<8x128xf32> to vector<8xf32>
      %39 = vector.shape_cast %38 : vector<8xf32> to vector<8x1xf32>
      %cst_18 = arith.constant dense<0.000000e+00> : vector<8x8xf32>
      %40 = tpu.matmul %0, %0, %cst_18 {dimension_numbers = #tpu.dot_dimension_numbers<[1], [1], [0], [0], [0, 0, 1, 0], [], []>} : vector<8x128xf32>, vector<8x128xf32>, vector<8x8xf32> -> vector<8x8xf32>
      %41 = math.sqrt %39 : vector<8x1xf32>
      %42 = tpu.transpose %41, [1, 0] : vector<8x1xf32> -> vector<1x8xf32>
      %43 = vector.broadcast %41 : vector<8x1xf32> to vector<8x8xf32>
      %44 = vector.broadcast %42 : vector<1x8xf32> to vector<8x8xf32>
      %45 = arith.mulf %43, %44 : vector<8x8xf32>
      %cst_19 = arith.constant 9.99999996E-13 : f32
      %46 = vector.broadcast %cst_19 : f32 to vector<8x8xf32>
      %47 = arith.addf %45, %46 : vector<8x8xf32>
      %48 = arith.divf %40, %47 : vector<8x8xf32>
      %cst_20 = arith.constant 9.99999996E-13 : f32
      %49 = vector.broadcast %cst_20 : f32 to vector<8x1xf32>
      %50 = arith.addf %39, %49 : vector<8x1xf32>
      %51 = arith.divf %39, %50 : vector<8x1xf32>
      %52 = vector.shape_cast %51 : vector<8x1xf32> to vector<1x8x1xf32>
      %cst_21 = arith.constant dense<0.000000e+00> : vector<1xf32>
      %53 = vector.multi_reduction <add>, %52, %cst_21 [1, 2] : vector<1x8x1xf32> to vector<1xf32>
      %54 = vector.shape_cast %53 : vector<1xf32> to vector<1x1x1xf32>
      %55 = vector.extract %54[0, 0, 0] : f32 from vector<1x1x1xf32>
      %56 = vector.shape_cast %48 : vector<8x8xf32> to vector<1x8x8xf32>
      %cst_22 = arith.constant dense<0.000000e+00> : vector<1xf32>
      %57 = vector.multi_reduction <add>, %56, %cst_22 [1, 2] : vector<1x8x8xf32> to vector<1xf32>
      %58 = vector.shape_cast %57 : vector<1xf32> to vector<1x1x1xf32>
      %59 = vector.extract %58[0, 0, 0] : f32 from vector<1x1x1xf32>
      %60 = arith.subf %59, %55 : f32
      %cst_23 = arith.constant 6.400000e+01 : f32
      %61 = arith.addf %60, %cst_23 : f32
      %cst_24 = arith.constant 1.000000e+01 : f32
      %62 = arith.mulf %cst_24, %61 : f32
      %cst_25 = arith.constant 7.000000e-12 : f32
      %63 = arith.addf %cst_25, %62 : f32
      %c0_26 = arith.constant 0 : index
      %c0_27 = arith.constant 0 : index
      %c0_28 = arith.constant 0 : index
      %64 = vector.load %arg4[%c0_26, %c0_27, %c0_28] : memref<1x8x128xf32, #tpu.memory_space<vmem>>, vector<1x8x128xf32>
      %65 = vector.broadcast %63 : f32 to vector<1x8x128xf32>
      %66 = arith.addf %64, %65 : vector<1x8x128xf32>
      %c0_29 = arith.constant 0 : index
      %c0_30 = arith.constant 0 : index
      %c0_31 = arith.constant 0 : index
      %67 = vector.load %arg4[%c0_29, %c0_30, %c0_31] : memref<1x8x128xf32, #tpu.memory_space<vmem>>, vector<1x8x128xf32>
      tpu.vector_store %arg4[%c0_29, %c0_30, %c0_31], %66 {strides = array<i32>} : memref<1x8x128xf32, #tpu.memory_space<vmem>>, vector<1x8x128xf32>,
    } else {
    }
    return
  }
  func.func @transform_0(%arg0: i32) -> (i32, i32) {
    %c0_i32 = arith.constant 0 : i32
    %c0_i32_0 = arith.constant 0 : i32
    return %arg0, %c0_i32 : i32, i32
  }
  func.func @transform_1(%arg0: i32) -> (i32, i32) {
    %c0_i32 = arith.constant 0 : i32
    %c0_i32_0 = arith.constant 0 : i32
    return %arg0, %c0_i32 : i32, i32
  }
  func.func @transform_2(%arg0: i32) -> (i32, i32) {
    %c0_i32 = arith.constant 0 : i32
    %c0_i32_0 = arith.constant 0 : i32
    %c0_i32_1 = arith.constant 0 : i32
    return %c0_i32, %c0_i32_0 : i32, i32
  }
  func.func @transform_3(%arg0: i32) -> (i32, i32, i32) {
    %c0_i32 = arith.constant 0 : i32
    %c0_i32_0 = arith.constant 0 : i32
    %c0_i32_1 = arith.constant 0 : i32
    return %arg0, %c0_i32, %c0_i32_0 : i32, i32, i32
  }
}

</mosaic_0001>

<bundles_post_ra>
// kernel: tpu_custom_call.1
= control target key start
LH: loop header
LB: loop body
LE: loop exit
PB: predicated region body
PF: predicated region fallthrough
CT: control target
= control target key end

     0   :  { %s443_s0 = inlined_call_operand.vmem [shape: s32[16,1], index: 0, kind: input, shape index: {}]   ;;  %s444_s1 = inlined_call_operand.vmem [shape: f32[16,128], index: 1, kind: input, shape index: {}]   ;;  %s445_s2 = inlined_call_operand.vmem [shape: f32[8,128], index: 2, kind: input, shape index: {}]   ;;  %s446_s3 = inlined_call_operand.hbm [shape: f32[1,8,128], index: 3, kind: output, shape index: {}]  }
   0x1   :  { %v16_v0 = vld [vmem:[%s443_s0] sm:$0xff] }
   0x2   :  { %8 = vsyncpa [#allocation3], 0  ;;  %v386_v1 = vmov 0   ;;  %v17_v2 = vld [vmem:[%s443_s0 + $0x8] sm:$0xff]  ;;  %v387_v3 = vmov 0.0   ;;  %v15_v4 = vld [vmem:[%s445_s2] sm:$0xff]  ;;  %v18_v6 = vlaneseq }
   0x3   :  { %355 = vset.pattern.permute.xlu0 %v386_v1  ;;  %340 = vmatprep.subr.mxu1 %v387_v3  ;;  %v161_v5 = vmul.f32 %v15_v4, %v15_v4  ;;  %vm388_vm0 = vmmov 0   ;;  %vm32_vm1 = vcmask 64512   ;;  %v115_v14 = vld [vmem:[%s444_s1 + $0x8] sm:$0xff]  ;;  %v114_v16 = vld [vmem:[%s444_s1] sm:$0xff]  ;;  %vm139_vm4 = vcmask 7168   ;;  %s389_s27 = smov [#allocation2]  }
   0x4   :  { %21 = vperm.xlu0 %355, %v16_v0   ;;  %335 = vmatprep.subr.mxu0 %v15_v4  ;;  %v19_v7 = vand.u32 127, %v18_v6  ;;  %v274_v41 = vshrl.u32 %v18_v6, 7  ;;  %s318_s28 = sshll.u32 %s389_s27, 4  ;;  %s319_s28 = int_to_ptr.vmem [resolvable:$true] %s318_s28 }
   0x5   :  { %336 = vmatpush3.msra.mxu0 %v15_v4  ;;  %341 = vmatpush3.xpose.msra.mxu1 %v15_v4  ;;  %s362_s29 = scalar_lea.vmem %s319_s28, 128  ;;  %p367_p1 = scmp.lt.s32.totalorder %s319_s28, %s319_s28 }
   0x6   :  { %342 = vmatprep.mubr.msk.f32.mxu1 %vm388_vm0, %v387_v3  ;;  %162 = vadd.xlane.f32.xlu1 %v161_v5  ;;  %v275_v42 = vsub.s32 0, %v274_v41  ;;  %p363_p0 = scmp.ne.s32.totalorder %s319_s28, %s362_s29  ;;  %p368_p2 = scmp.lt.s32.totalorder %s362_s29, %s362_s29 }
   0x8   :  { %24 = vperm.xlu0 %355, %v17_v2   ;;  %343 = vmatmul.mubr.f32.vlgmr.msra.gmra.mrb[0].mxu1 %v15_v4  ;;  %p369_p3 = por %p368_p2, %p367_p1 }
   0xa   :  { %p370_p4 = pnand %p369_p3, %p363_p0 }
  0x83   :  { %v22_v8 = vpop.permute.xlu0 %21 }
  0x84   :  { %vm26_vm2 = vcmp.eq.s32.totalorder %v19_v7, %v22_v8 }
  0x85   :  { %v326_v9 = vsel %vm26_vm2, 1.0, %v387_v3 }
  0x86   :  { %337 = vmatprep.mubr.msk.f32.mxu0 %vm32_vm1, %v326_v9 }
  0x87   :  { %v25_v10 = vpop.permute.xlu0 %24 }
  0x88   :  { %vm27_vm3 = vcmp.eq.s32.totalorder %v19_v7, %v25_v10 }
  0x89   :  { %v327_v11 = vsel %vm27_vm3, 1.0, %v387_v3 }
  0x8a   :  { %338 = vmatmul.mubr.msk.f32.vlgmr.msra.gmra.mrb[0].mxu0 %vm32_vm1, %v327_v11 }
  0x93   :  { %v163_v12 = vpop.xlane.xlu1 %162 }
  0x94   :  { %v281_v13 = vadd.f32 1e-12, %v163_v12  ;;  %vm236_vm5 = vcmp.eq.f32.partialorder %v163_v12, inf  ;;  %v239_v27 = vand.u32 2147483648, %v163_v12  ;;  %vm238_vm6 = vcmp.eq.f32.partialorder %v163_v12, 0.0 }
  0x96   :  { %356 = vrcp.f32 %v281_v13 }
  0x97   :  { %358 = vrsqrt.f32 %v163_v12 }
  0xa0   :  { %v357_v15 = vpop.eup %356 }
  0xa1   :  { %v283_v21 = vmul.f32 %v357_v15, %v163_v12  ;;  %v359_v25 = vpop.eup %358 }
  0xa2   :  { %v235_v26 = vmul.f32 %v359_v25, %v163_v12 }
  0xa3   :  { %v284_v24 = vsel %vm139_vm4, %v283_v21, 0.0 }
  0xa4   :  { %v237_v28 = vsel %vm236_vm5, %v163_v12, %v235_v26 }
  0xa5   :  { %v240_v29 = vsel %vm238_vm6, %v239_v27, %v237_v28 }
  0xdb   :  { %v230_v30 = vpop.f32.mrb[0].mxu1 }
  0xdc   :  { %v344_v31 = vpop.f32.mrb[1].mxu1 }
 0x15d   :  { %v339_v17 = vpop.f32.mrb[0].mxu0 }
 0x15e   :  { %v117_v18 = vsub.f32 %v115_v14, %v339_v17  ;;  %v105_v19 = vpop.f32.mrb[1].mxu0 }
 0x15f   :  { %v116_v20 = vsub.f32 %v114_v16, %v105_v19 }
 0x160   :  { %v119_v22 = vmul.f32 %v117_v18, %v117_v18 }
 0x161   :  { %v118_v23 = vmul.f32 %v116_v20, %v116_v20 }
 0x162   :  { %122 = vadd.xlane.f32.xlu0 %v119_v22 }
 0x163   :  { %120 = vadd.xlane.f32.xlu1 %v118_v23 }
 0x166   :  { %285 = vadd.xlane.f32.xlu0 %v284_v24 }
 0x196   :  { %241 = vxpose.xlu1.b32.start.end [1/1] (short) (narrow) %v240_v29, 8 }
 0x1ef   :  { %v123_v32 = vpop.xlane.xlu0 %122 }
 0x1f0   :  { %v125_v33 = vmax.f32 %v123_v32, 1e-12  ;;  %v121_v34 = vpop.xlane.xlu1 %120 }
 0x1f1   :  { %v124_v35 = vmax.f32 %v121_v34, 1e-12 }
 0x1f2   :  { %v127_v36 = vmin.f32 %v125_v33, 1e+12 }
 0x1f3   :  { %v126_v37 = vmin.f32 %v124_v35, 1e+12  ;;  %v286_v50 = vpop.xlane.xlu0 %285 }
 0x1f4   :  { %v141_v38 = vsel %vm139_vm4, %v127_v36, 0.0  ;;  %v287_v51 = vrot.slane %v286_v50, 4 }
 0x1f5   :  { %v140_v39 = vsel %vm139_vm4, %v126_v37, 0.0 }
 0x1f6   :  { %v142_v40 = vadd.f32 %v141_v38, %v140_v39  ;;  %v288_v52 = vadd.f32 %v287_v51, %v286_v50 }
 0x1f8   :  { %143 = vadd.xlane.f32.xlu0 %v142_v40  ;;  %v289_v53 = vrot.slane %v288_v52, 2 }
 0x1fa   :  { %v290_v57 = vadd.f32 %v289_v53, %v288_v52 }
 0x1fc   :  { %v291_v60 = vrot.slane %v290_v57, 1 }
 0x1fe   :  { %v292_v63 = vadd.f32 %v291_v60, %v290_v57 }
 0x216   :  { %v257_v43 = vpop.trf.xlu1 }
 0x217   :  { %v276_v44 = vrot.slane %v257_v43, %v275_v42 }
 0x219   :  { %v277_v45 = vmul.f32 %v276_v44, %v240_v29 }
 0x21b   :  { %v278_v46 = vadd.f32 1e-12, %v277_v45 }
 0x21d   :  { %360 = vrcp.f32 %v278_v46 }
 0x227   :  { %v361_v47 = vpop.eup %360 }
 0x228   :  { %v280_v48 = vmul.f32 %v361_v47, %v230_v30 }
 0x22a   :  { %v294_v49 = vsel %vm32_vm1, %v280_v48, 0.0 }
 0x22b   :  { %295 = vadd.xlane.f32.xlu0 %v294_v49 }
 0x285   :  { %v144_v54 = vpop.xlane.xlu0 %143 }
 0x286   :  { %v145_v55 = vrot.slane %v144_v54, 4 }
 0x288   :  { %v146_v56 = vadd.f32 %v145_v55, %v144_v54 }
 0x28a   :  { %v147_v58 = vrot.slane %v146_v56, 2 }
 0x28c   :  { %v148_v59 = vadd.f32 %v147_v58, %v146_v56 }
 0x28e   :  { %v149_v61 = vrot.slane %v148_v59, 1 }
 0x290   :  { %v150_v62 = vadd.f32 %v149_v61, %v148_v59 }
 0x292   :  { %345 = vpush %v150_v62 }
 0x293   :  { %347 = vpush %v292_v63 }
 0x2b8   :  { %v296_v0 = vpop.xlane.xlu0 %295 }
 0x2b9   :  { %v297_v1 = vrot.slane %v296_v0, 4 }
 0x2bb   :  { %v298_v2 = vadd.f32 %v297_v1, %v296_v0 }
 0x2bd   :  { %v299_v3 = vrot.slane %v298_v2, 2 }
 0x2bf   :  { %v300_v4 = vadd.f32 %v299_v3, %v298_v2 }
 0x2c1   :  { %v301_v5 = vrot.slane %v300_v4, 1 }
 0x2c3   :  { %v302_v6 = vadd.f32 %v301_v5, %v300_v4  ;;  %s346_s1 = spop %345 }
 0x2c4   :  { %s348_s20 = spop %347  ;;  %s154_s24 = smul.f32 0.0625, %s346_s1 }
 0x2c5   :  { %349 = vpush %v302_v6 }
 0x2c6   :  { %v155_v7 = vstv %s154_s24 }
 0x2f6   :  { %s350_s21 = spop %349 }
 0x2f7   :  { %s304_s22 = ssub.f32 %s350_s21, %s348_s20 }
 0x2f9   :  { %s305_s23 = sadd.f32 64.0, %s304_s22 }
 0x2fb   :  { %s306_s25 = smul.f32 10.0, %s305_s23 }
 0x2fd   :  { %s307_s26 = sadd.f32 7e-12, %s306_s25 }
 0x2ff   :  { %v309_v8 = vstv %s307_s26 }
 0x300   :  { %v310_v9 = vadd.f32 %v309_v8, %v155_v7 }
 0x302   :  { %311 = vst [vmem:[#allocation2] sm:$0xff] %v310_v9 }
 0x303   :  { %373 = shalt.err (!%p370_p4)
}
 0x304   :  { %s374_s5 = scalar_lea.hbm %s446_s3, 128 }
 0x305   :  { %p375_p5 = scmp.ne.s32.totalorder %s446_s3, %s374_s5  ;;  %p378_p6 = scmp.lt.u32.totalorder %s374_s5, %s446_s3 }
 0x307   :  { %p380_p7 = pnand %p378_p6, %p375_p5 }
 0x309   :  { %383 = shalt.err (!%p380_p7)
}
 0x30a   :  { %321 = dma.vmem_to_hbm [thread:$0]  %s319_s28, 128, %s446_s3, [#allocation3]  }
 0x30b   :  { %384 = dma.done.wait [#allocation3], 128  }
 0x30c   :  { %385 = vsyncadd [#allocation3], 4294967168 }
 0x30d   :  { %325 = vsyncpa [#allocation3], 1 }

</bundles_post_ra>
